<compile_context>
chip_gen: v6e
topology: v6e:2x2x1
jax: 0.10.0
libtpu: 0.0.40
codegen_flags: <defaults>
</compile_context>

<pallas_src>
import jax
import jax.numpy as jnp
from jax.experimental import pallas as pl
from jax.experimental.pallas import tpu as pltpu

_LANE = 128  # TPU lane width; rows are grouped in slabs of 128 for lane-dense output


def _objective_kernel(x_ref, c_ref, o_ref):
    # x_ref: (TB, 128, D) VMEM tile of design points (128 rows per lane-dense slab)
    # c_ref: (1, 1, D)    center, broadcast over rows (VPU)
    # o_ref: (TB, 128)    lane-dense output slab (unmasked vst)
    diff = x_ref[...] - c_ref[...]                  # VPU elementwise
    o_ref[...] = -jnp.sum(diff * diff, axis=-1)     # lane reduce + relayout (XLU has slack)


class ObjectiveFunction:
    """JAX/Pallas port of boqn.objective_function.ObjectiveFunction."""

    def __init__(self, objective_function):
        self.objective_function = objective_function
        self.X_pending = None

    def __call__(self, X):
        return self.forward(X)

    def forward(self, X):
        return self.objective_function(X)


def make_quadratic_objective(center, rows128_per_block=8):
    """Pallas-backed objective f(X) = -||X - center||^2 row-wise.

    rows128_per_block: number of 128-row slabs per grid step (TB). TB=8 -> a
    1024-row x 128-lane-padded f32 tile is ~512 KiB, ~1 MiB double-buffered,
    comfortably under every generation's scoped-VMEM default.
    """
    center = jnp.asarray(center, dtype=jnp.float32).reshape(1, 1, -1)
    D = center.shape[-1]

    @jax.jit
    def objective(X):
        # Keep compute in f32 (v5e VPU has no bf16 path).
        X = jnp.asarray(X, dtype=jnp.float32)
        N = X.shape[0]

        n128 = pl.cdiv(N, _LANE)                 # number of 128-row slabs
        tb = min(rows128_per_block, n128)        # slabs per grid step
        n_blocks = pl.cdiv(n128, tb)             # grid extent
        n_pad = n_blocks * tb * _LANE            # padded row count

        # Zero-pad rows (padded results are computed but discarded) and present a
        # lane-dense (slabs, 128, D) view — a free row-major reshape, no transpose.
        Xp = jnp.pad(X, ((0, n_pad - N), (0, 0)))
        X3 = Xp.reshape(n_blocks * tb, _LANE, D)

        out = pl.pallas_call(
            _objective_kernel,
            out_shape=jax.ShapeDtypeStruct((n_blocks * tb, _LANE), jnp.float32),
            grid_spec=pl.GridSpec(
                grid=(n_blocks,),
                in_specs=[
                    pl.BlockSpec((tb, _LANE, D), lambda i: (i, 0, 0)),
                    pl.BlockSpec((1, 1, D), lambda i: (0, 0, 0)),
                ],
                out_specs=pl.BlockSpec((tb, _LANE), lambda i: (i, 0)),
            ),
            compiler_params=pltpu.CompilerParams(
                # Independent row tiles -> shard across TensorCores on v7x.
                dimension_semantics=("parallel",),
                # Explicit, generation-safe scoped-VMEM budget (tiles are ~1 MiB).
                vmem_limit_bytes=32 * 1024 * 1024,
            ),
            cost_estimate=pl.CostEstimate(
                flops=3 * n_pad * D,
                transcendentals=0,
                bytes_accessed=4 * n_pad * D + 4 * n_pad + 4 * D,
            ),
        )(X3, center)

        return out.reshape(-1)[:N]  # squeeze back to (N,)

    return objective


if __name__ == "__main__":
    key = jax.random.PRNGKey(0)
    D = 32
    kx_small, kc, kx_big = jax.random.split(key, 3)

    center = jax.random.normal(kc, (D,), dtype=jnp.float32)
    obj_fn = make_quadratic_objective(center)
    module = ObjectiveFunction(obj_fn)

    # Tiny BO-style design matrix (single-block path, heavy tail padding).
    X_small = jax.random.normal(kx_small, (8, D), dtype=jnp.float32)
    y_small = module.forward(X_small)
    jax.block_until_ready(y_small)
    ref_small = -jnp.sum((X_small - center[None, :]) ** 2, axis=-1)
    assert y_small.shape == (8,)
    assert jnp.allclose(y_small, ref_small, atol=1e-4, rtol=1e-4)

    # Larger matrix (multi-step parallel grid + non-multiple-of-tile tail).
    X_big = jax.random.normal(kx_big, (1536, D), dtype=jnp.float32)
    y_big = module.forward(X_big)
    jax.block_until_ready(y_big)
    ref_big = -jnp.sum((X_big - center[None, :]) ** 2, axis=-1)
    assert y_big.shape == (1536,)
    assert jnp.allclose(y_big, ref_big, atol=1e-4, rtol=1e-4)

    print("KERNEL_OK")
</pallas_src>

<mosaic_0001>
module attributes {stable_mosaic.version = 11 : i64} {
  func.func @_objective_kernel(%arg0: i32, %arg1: memref<1x128x32xf32, #tpu.memory_space<vmem>>, %arg2: memref<1x1x32xf32, #tpu.memory_space<vmem>>, %arg3: memref<1x128xf32, #tpu.memory_space<vmem>>) attributes {dimension_semantics = [#tpu.dimension_semantics<parallel>], iteration_bounds = array<i64: 1>, scalar_prefetch = 0 : i64, scratch_operands = 0 : i64, tpu.core_type = #tpu.core_type<tc>, window_params = [{transform_indices = @transform_0, window_bounds = array<i64: 1, 128, 32>}, {pipeline_mode = #tpu.pipeline_mode<synchronous>, transform_indices = @transform_1, window_bounds = array<i64: 1, 1, 32>}, {transform_indices = @transform_2, window_bounds = array<i64: 1, 128>}]} {
    %c0 = arith.constant 0 : index
    %c0_0 = arith.constant 0 : index
    %c0_1 = arith.constant 0 : index
    %0 = vector.load %arg1[%c0, %c0_0, %c0_1] : memref<1x128x32xf32, #tpu.memory_space<vmem>>, vector<1x128x32xf32>
    %c0_2 = arith.constant 0 : index
    %c0_3 = arith.constant 0 : index
    %c0_4 = arith.constant 0 : index
    %1 = vector.load %arg2[%c0_2, %c0_3, %c0_4] : memref<1x1x32xf32, #tpu.memory_space<vmem>>, vector<1x1x32xf32>
    %2 = vector.broadcast %1 : vector<1x1x32xf32> to vector<1x128x32xf32>
    %3 = arith.subf %0, %2 : vector<1x128x32xf32>
    %4 = arith.mulf %3, %3 : vector<1x128x32xf32>
    %cst = arith.constant dense<0.000000e+00> : vector<1x128xf32>
    %5 = vector.multi_reduction <add>, %4, %cst [2] : vector<1x128x32xf32> to vector<1x128xf32>
    %cst_5 = arith.constant 0.000000e+00 : f32
    %6 = vector.broadcast %cst_5 : f32 to vector<1x128xf32>
    %7 = arith.subf %6, %5 : vector<1x128xf32>
    %c0_6 = arith.constant 0 : index
    %c0_7 = arith.constant 0 : index
    %8 = vector.load %arg3[%c0_6, %c0_7] : memref<1x128xf32, #tpu.memory_space<vmem>>, vector<1x128xf32>
    tpu.vector_store %arg3[%c0_6, %c0_7], %7 {strides = array<i32>} : memref<1x128xf32, #tpu.memory_space<vmem>>, vector<1x128xf32>,
    return
  }
  func.func @transform_0(%arg0: i32) -> (i32, i32, i32) {
    %c0_i32 = arith.constant 0 : i32
    %c0_i32_0 = arith.constant 0 : i32
    %c0_i32_1 = arith.constant 0 : i32
    return %arg0, %c0_i32, %c0_i32_0 : i32, i32, i32
  }
  func.func @transform_1(%arg0: i32) -> (i32, i32, i32) {
    %c0_i32 = arith.constant 0 : i32
    %c0_i32_0 = arith.constant 0 : i32
    %c0_i32_1 = arith.constant 0 : i32
    %c0_i32_2 = arith.constant 0 : i32
    return %c0_i32, %c0_i32_0, %c0_i32_1 : i32, i32, i32
  }
  func.func @transform_2(%arg0: i32) -> (i32, i32) {
    %c0_i32 = arith.constant 0 : i32
    %c0_i32_0 = arith.constant 0 : i32
    return %arg0, %c0_i32 : i32, i32
  }
}

</mosaic_0001>

<bundles_post_ra>
// kernel: objective.1
= control target key start
LH: loop header
LB: loop body
LE: loop exit
PB: predicated region body
PF: predicated region fallthrough
CT: control target
= control target key end

     0   :  { %vm66_vm0 = vcmask 261120   ;;  %vm158_vm1 = vcmask 130112   ;;  %vm165_vm2 = vcmask 195712   ;;  %vm172_vm3 = vcmask 261312   ;;  %s404_s0 = inlined_call_operand.vmem [shape: f32[1,128,32], index: 0, kind: input, shape index: {}]   ;;  %s405_s1 = inlined_call_operand.vmem [shape: f32[1,1,32], index: 1, kind: input, shape index: {}]   ;;  %s406_s2 = inlined_call_operand.vmem [shape: f32[1,128], index: 2, kind: output, shape index: {}]  }
   0x1   :  { %v11_v0 = vld [vmem:[%s404_s0] sm:$0xff]  ;;  %v13_v2 = vld [vmem:[%s404_s0 + $0x10] sm:$0xff]  ;;  %v12_v5 = vld [vmem:[%s404_s0 + $0x8] sm:$0xff]  ;;  %vm179_vm4 = vcmask 326912   ;;  %vm186_vm5 = vcmask 392512   ;;  %vm193_vm6 = vcmask 458112  }
   0x2   :  { %v286_v1 = vld [vmem:[%s405_s1] ss:$0 sm:$0xff]  ;;  %v14_v6 = vld [vmem:[%s404_s0 + $0x18] sm:$0xff]  ;;  %v16_v10 = vld [vmem:[%s404_s0 + $0x28] sm:$0xff]  ;;  %vm200_vm7 = vcmask 523712   ;;  %vm207_vm8 = vcmask 589312  }
   0x3   :  { %v34_v3 = vsub.f32 %v11_v0, %v286_v1  ;;  %v36_v4 = vsub.f32 %v13_v2, %v286_v1  ;;  %v15_v7 = vld [vmem:[%s404_s0 + $0x20] sm:$0xff]  ;;  %v35_v8 = vsub.f32 %v12_v5, %v286_v1  ;;  %v37_v9 = vsub.f32 %v14_v6, %v286_v1  ;;  %v17_v15 = vld [vmem:[%s404_s0 + $0x30] sm:$0xff]  ;;  %v18_v16 = vld [vmem:[%s404_s0 + $0x38] sm:$0xff] }
   0x4   :  { %v38_v13 = vsub.f32 %v15_v7, %v286_v1  ;;  %v39_v14 = vsub.f32 %v16_v10, %v286_v1  ;;  %v40_v21 = vsub.f32 %v17_v15, %v286_v1  ;;  %v41_v22 = vsub.f32 %v18_v16, %v286_v1  ;;  %v19_v27 = vld [vmem:[%s404_s0 + $0x40] sm:$0xff]  ;;  %v20_v28 = vld [vmem:[%s404_s0 + $0x48] sm:$0xff]  ;;  %v21_v35 = vld [vmem:[%s404_s0 + $0x50] sm:$0xff] }
   0x5   :  { %v50_v11 = vmul.f32 %v34_v3, %v34_v3  ;;  %v52_v12 = vmul.f32 %v36_v4, %v36_v4  ;;  %v51_v17 = vmul.f32 %v35_v8, %v35_v8  ;;  %v53_v18 = vmul.f32 %v37_v9, %v37_v9  ;;  %v22_v36 = vld [vmem:[%s404_s0 + $0x58] sm:$0xff]  ;;  %v23_v43 = vld [vmem:[%s404_s0 + $0x60] sm:$0xff]  ;;  %v24_v44 = vld [vmem:[%s404_s0 + $0x68] sm:$0xff] }
   0x6   :  { %v54_v25 = vmul.f32 %v38_v13, %v38_v13  ;;  %v55_v26 = vmul.f32 %v39_v14, %v39_v14  ;;  %v56_v29 = vmul.f32 %v40_v21, %v40_v21  ;;  %v57_v30 = vmul.f32 %v41_v22, %v41_v22  ;;  %v25_v51 = vld [vmem:[%s404_s0 + $0x70] sm:$0xff]  ;;  %v26_v52 = vld [vmem:[%s404_s0 + $0x78] sm:$0xff] }
   0x7   :  { %v67_v19 = vsel %vm66_vm0, %v50_v11, 0.0  ;;  %v73_v20 = vsel %vm66_vm0, %v52_v12, 0.0  ;;  %v70_v23 = vsel %vm66_vm0, %v51_v17, 0.0  ;;  %v76_v24 = vsel %vm66_vm0, %v53_v18, 0.0 }
   0x8   :  { %68 = vadd.xlane.f32.xlu0 %v67_v19  ;;  %74 = vadd.xlane.f32.xlu1 %v73_v20  ;;  %v79_v31 = vsel %vm66_vm0, %v54_v25, 0.0  ;;  %v82_v32 = vsel %vm66_vm0, %v55_v26, 0.0  ;;  %v42_v33 = vsub.f32 %v19_v27, %v286_v1  ;;  %v43_v34 = vsub.f32 %v20_v28, %v286_v1 }
   0x9   :  { %v85_v37 = vsel %vm66_vm0, %v56_v29, 0.0  ;;  %v88_v38 = vsel %vm66_vm0, %v57_v30, 0.0  ;;  %v44_v41 = vsub.f32 %v21_v35, %v286_v1  ;;  %v45_v42 = vsub.f32 %v22_v36, %v286_v1 }
   0xa   :  { %v58_v39 = vmul.f32 %v42_v33, %v42_v33  ;;  %v59_v40 = vmul.f32 %v43_v34, %v43_v34  ;;  %v46_v45 = vsub.f32 %v23_v43, %v286_v1  ;;  %v47_v46 = vsub.f32 %v24_v44, %v286_v1 }
   0xb   :  { %v60_v49 = vmul.f32 %v44_v41, %v44_v41  ;;  %v61_v50 = vmul.f32 %v45_v42, %v45_v42  ;;  %v48_v54 = vsub.f32 %v25_v51, %v286_v1  ;;  %v49_v58 = vsub.f32 %v26_v52, %v286_v1 }
   0xc   :  { %71 = vadd.xlane.f32.xlu0 %v70_v23  ;;  %77 = vadd.xlane.f32.xlu1 %v76_v24  ;;  %v91_v47 = vsel %vm66_vm0, %v58_v39, 0.0  ;;  %v94_v48 = vsel %vm66_vm0, %v59_v40, 0.0  ;;  %v62_v53 = vmul.f32 %v46_v45, %v46_v45  ;;  %v63_v57 = vmul.f32 %v47_v46, %v47_v46 }
   0xd   :  { %v97_v55 = vsel %vm66_vm0, %v60_v49, 0.0  ;;  %v100_v56 = vsel %vm66_vm0, %v61_v50, 0.0  ;;  %v64_v61 = vmul.f32 %v48_v54, %v48_v54  ;;  %v65_v62 = vmul.f32 %v49_v58, %v49_v58 }
   0xe   :  { %v103_v59 = vsel %vm66_vm0, %v62_v53, 0.0  ;;  %v106_v60 = vsel %vm66_vm0, %v63_v57, 0.0  ;;  %v147_v2 = vlaneseq  ;;  %vm214_vm9 = vcmask 654912  }
   0xf   :  { %v109_v63 = vsel %vm66_vm0, %v64_v61, 0.0  ;;  %v112_v0 = vsel %vm66_vm0, %v65_v62, 0.0  ;;  %vm221_vm10 = vcmask 720512   ;;  %vm228_vm11 = vcmask 786112  }
  0x10   :  { %80 = vadd.xlane.f32.xlu0 %v79_v31  ;;  %83 = vadd.xlane.f32.xlu1 %v82_v32  ;;  %v365_v3 = vand.u32 127, %v147_v2  ;;  %v367_v1 = vshrl.u32 %v147_v2, 7  ;;  %vm235_vm12 = vcmask 851712   ;;  %vm242_vm13 = vcmask 917312  }
  0x11   :  { %vm249_vm14 = vcmask 982912   ;;  %vm256_vm15 = vcmask 1048512  }
  0x12   :  { %v153_v4 = vadd.s32 4294967288, %v365_v3  ;;  %v167_v5 = vadd.s32 4294967272, %v365_v3  ;;  %v160_v7 = vadd.s32 4294967280, %v365_v3  ;;  %v174_v9 = vadd.s32 4294967264, %v365_v3 }
  0x13   :  { %v151_v10 = vsub.s32 %v365_v3, %v367_v1  ;;  %v181_v18 = vadd.s32 4294967256, %v365_v3  ;;  %v188_v25 = vadd.s32 4294967248, %v365_v3  ;;  %v195_v30 = vadd.s32 4294967240, %v365_v3 }
  0x14   :  { %86 = vadd.xlane.f32.xlu0 %v85_v37  ;;  %89 = vadd.xlane.f32.xlu1 %v88_v38  ;;  %v156_v12 = vsub.s32 %v153_v4, %v367_v1  ;;  %v170_v13 = vsub.s32 %v167_v5, %v367_v1  ;;  %v163_v14 = vsub.s32 %v160_v7, %v367_v1  ;;  %v202_v38 = vadd.s32 4294967232, %v365_v3 }
  0x15   :  { %v177_v21 = vsub.s32 %v174_v9, %v367_v1  ;;  %v184_v28 = vsub.s32 %v181_v18, %v367_v1  ;;  %v191_v37 = vsub.s32 %v188_v25, %v367_v1  ;;  %v198_v41 = vsub.s32 %v195_v30, %v367_v1 }
  0x16   :  { %v209_v43 = vadd.s32 4294967224, %v365_v3  ;;  %v216_v49 = vadd.s32 4294967216, %v365_v3  ;;  %v230_v61 = vadd.s32 4294967200, %v365_v3  ;;  %v237_v5 = vadd.s32 4294967192, %v365_v3 }
  0x18   :  { %92 = vadd.xlane.f32.xlu0 %v91_v47  ;;  %95 = vadd.xlane.f32.xlu1 %v94_v48  ;;  %v205_v48 = vsub.s32 %v202_v38, %v367_v1  ;;  %v212_v53 = vsub.s32 %v209_v43, %v367_v1 }
  0x1c   :  { %98 = vadd.xlane.f32.xlu0 %v97_v55  ;;  %101 = vadd.xlane.f32.xlu1 %v100_v56  ;;  %v223_v55 = vadd.s32 4294967208, %v365_v3 }
  0x1e   :  { %v226_v2 = vsub.s32 %v223_v55, %v367_v1 }
  0x20   :  { %104 = vadd.xlane.f32.xlu0 %v103_v59  ;;  %107 = vadd.xlane.f32.xlu1 %v106_v60  ;;  %v219_v60 = vsub.s32 %v216_v49, %v367_v1 }
  0x24   :  { %110 = vadd.xlane.f32.xlu0 %v109_v63  ;;  %113 = vadd.xlane.f32.xlu1 %v112_v0 }
  0x91   :  { %v69_v6 = vpop.xlane.xlu0 %68  ;;  %v75_v8 = vpop.xlane.xlu1 %74 }
  0x92   :  { %v115_v11 = vsub.f32 0.0, %v69_v6  ;;  %v117_v15 = vsub.f32 0.0, %v75_v8 }
  0x94   :  { %v152_v22 = vrot.slane %v115_v11, %v151_v10  ;;  %v164_v26 = vrot.slane %v117_v15, %v163_v14  ;;  %v233_v10 = vsub.s32 %v230_v61, %v367_v1  ;;  %v244_v11 = vadd.s32 4294967184, %v365_v3 }
  0x95   :  { %v72_v16 = vpop.xlane.xlu0 %71  ;;  %v78_v17 = vpop.xlane.xlu1 %77 }
  0x96   :  { %v116_v19 = vsub.f32 0.0, %v72_v16  ;;  %v118_v20 = vsub.f32 0.0, %v78_v17  ;;  %v240_v16 = vsub.s32 %v237_v5, %v367_v1 }
  0x98   :  { %v157_v23 = vrot.slane %v116_v19, %v156_v12  ;;  %v171_v24 = vrot.slane %v118_v20, %v170_v13  ;;  %v251_v12 = vadd.s32 4294967176, %v365_v3 }
  0x99   :  { %v81_v27 = vpop.xlane.xlu0 %80  ;;  %v84_v29 = vpop.xlane.xlu1 %83 }
  0x9a   :  { %v159_v31 = vsel %vm158_vm1, %v157_v23, %v152_v22  ;;  %v119_v32 = vsub.f32 0.0, %v81_v27  ;;  %v120_v33 = vsub.f32 0.0, %v84_v29  ;;  %v247_v22 = vsub.s32 %v244_v11, %v367_v1 }
  0x9b   :  { %v166_v34 = vsel %vm165_vm2, %v164_v26, %v159_v31  ;;  %v254_v23 = vsub.s32 %v251_v12, %v367_v1 }
  0x9c   :  { %v173_v35 = vsel %vm172_vm3, %v171_v24, %v166_v34  ;;  %v178_v36 = vrot.slane %v119_v32, %v177_v21  ;;  %v185_v39 = vrot.slane %v120_v33, %v184_v28 }
  0x9d   :  { %v87_v40 = vpop.xlane.xlu0 %86  ;;  %v90_v42 = vpop.xlane.xlu1 %89 }
  0x9e   :  { %v180_v44 = vsel %vm179_vm4, %v178_v36, %v173_v35  ;;  %v121_v45 = vsub.f32 0.0, %v87_v40  ;;  %v122_v46 = vsub.f32 0.0, %v90_v42 }
  0x9f   :  { %v187_v50 = vsel %vm186_vm5, %v185_v39, %v180_v44 }
  0xa0   :  { %v192_v47 = vrot.slane %v121_v45, %v191_v37  ;;  %v199_v51 = vrot.slane %v122_v46, %v198_v41 }
  0xa1   :  { %v93_v52 = vpop.xlane.xlu0 %92  ;;  %v96_v54 = vpop.xlane.xlu1 %95 }
  0xa2   :  { %v194_v56 = vsel %vm193_vm6, %v192_v47, %v187_v50  ;;  %v123_v57 = vsub.f32 0.0, %v93_v52  ;;  %v124_v58 = vsub.f32 0.0, %v96_v54 }
  0xa3   :  { %v201_v62 = vsel %vm200_vm7, %v199_v51, %v194_v56 }
  0xa4   :  { %v206_v59 = vrot.slane %v123_v57, %v205_v48  ;;  %v213_v63 = vrot.slane %v124_v58, %v212_v53 }
  0xa5   :  { %v99_v0 = vpop.xlane.xlu0 %98  ;;  %v102_v4 = vpop.xlane.xlu1 %101 }
  0xa6   :  { %v208_v6 = vsel %vm207_vm8, %v206_v59, %v201_v62  ;;  %v125_v7 = vsub.f32 0.0, %v99_v0  ;;  %v126_v8 = vsub.f32 0.0, %v102_v4 }
  0xa7   :  { %v215_v13 = vsel %vm214_vm9, %v213_v63, %v208_v6 }
  0xa8   :  { %v220_v9 = vrot.slane %v125_v7, %v219_v60  ;;  %v227_v14 = vrot.slane %v126_v8, %v226_v2 }
  0xa9   :  { %v105_v15 = vpop.xlane.xlu0 %104  ;;  %v108_v17 = vpop.xlane.xlu1 %107 }
  0xaa   :  { %v222_v18 = vsel %vm221_vm10, %v220_v9, %v215_v13  ;;  %v127_v19 = vsub.f32 0.0, %v105_v15  ;;  %v128_v20 = vsub.f32 0.0, %v108_v17 }
  0xab   :  { %v229_v24 = vsel %vm228_vm11, %v227_v14, %v222_v18 }
  0xac   :  { %v234_v21 = vrot.slane %v127_v19, %v233_v10  ;;  %v241_v25 = vrot.slane %v128_v20, %v240_v16 }
  0xad   :  { %v111_v26 = vpop.xlane.xlu0 %110  ;;  %v114_v3 = vpop.xlane.xlu1 %113 }
  0xae   :  { %v236_v27 = vsel %vm235_vm12, %v234_v21, %v229_v24  ;;  %v129_v28 = vsub.f32 0.0, %v111_v26  ;;  %v130_v29 = vsub.f32 0.0, %v114_v3 }
  0xaf   :  { %v243_v32 = vsel %vm242_vm13, %v241_v25, %v236_v27 }
  0xb0   :  { %v248_v30 = vrot.slane %v129_v28, %v247_v22  ;;  %v255_v31 = vrot.slane %v130_v29, %v254_v23 }
  0xb2   :  { %v250_v33 = vsel %vm249_vm14, %v248_v30, %v243_v32 }
  0xb3   :  { %v257_v34 = vsel %vm256_vm15, %v255_v31, %v250_v33 }
  0xb4   :  { %259 = vst [vmem:[%s406_s2] sm:$0x1] %v257_v34 }

</bundles_post_ra>
